<compile_context>
chip_gen: v6e
topology: v6e:2x2x1
jax: 0.10.0
libtpu: 0.0.40
codegen_flags: <defaults>
</compile_context>

<pallas_src>
import jax
import jax.numpy as jnp
from jax import lax
from jax.experimental import pallas as pl
from jax.experimental.pallas import tpu as pltpu

# Feature sizes of the MLP: input_size -> 256 -> 128 -> 64 -> 32 -> 16 -> 8 -> 1
HIDDEN_DIMS = [256, 128, 64, 32, 16, 8, 1]
BN_EPS = 1e-5  # nn.BatchNorm1d default

# Contract the last dim of both operands: (M, K) x (N, K) -> (M, N)   (A @ B^T)
_NT_DIMS = (((1,), (1,)), ((), ()))


def _round_up(x, m):
    return (x + m - 1) // m * m


def _mlp_kernel(x_ref,
                w1, b1, w2, b2, w3, b3, w4, b4, w5, b5, w6, b6, w7, b7,
                o_ref):
    """Fused MLP forward for one batch tile (batch-on-lanes layout).

    x_ref : (TB, D_pad)  bf16 input tile (batch rows, zero-padded features)
    w1..w6: (out_i, in_i) bf16, BN-folded, PyTorch (out, in) layout
    b1..b6: (out_i, 1)    f32,  BN-folded
    w7    : (8, 1)        f32   final-layer weight as a column
    b7    : (1, 1)        f32
    o_ref : (1, TB)       f32   lane-dense output tile
    """
    # Layer 1: contract the shared feature dim of W1 (256, D_pad) and x (TB, D_pad)
    # -> (256, TB): features on sublanes, batch on lanes.  bf16 MXU, f32 accumulate.
    h = lax.dot_general(w1[...], x_ref[...], _NT_DIMS,
                        preferred_element_type=jnp.float32)
    h = jnp.maximum(h + b1[...], 0.0).astype(jnp.bfloat16)

    # Hidden layers 2..6: (out, in) @ (in, TB) -> (out, TB), bias + ReLU.
    for w_ref, b_ref in ((w2, b2), (w3, b3), (w4, b4), (w5, b5), (w6, b6)):
        z = jnp.dot(w_ref[...], h, preferred_element_type=jnp.float32)
        h = jnp.maximum(z + b_ref[...], 0.0).astype(jnp.bfloat16)

    # Final 8 -> 1 layer on VPU/XLU: broadcast-multiply + sublane reduction
    # (avoids a serialized M=1 MXU round trip).  Result stays lane-dense (1, TB).
    z = jnp.sum(h.astype(jnp.float32) * w7[...], axis=0, keepdims=True) + b7[...]
    o_ref[...] = (1.0 / (1.0 + jnp.exp(-z))).astype(o_ref.dtype)


def anomaly_detector_forward(x, params, *, batch_tile=512):
    """Run the fused AnomalyDetector forward pass via a Pallas TPU kernel.

    x      : (B, input_size) float32 (or bf16)
    params : dict with 'w1'..'w7', 'b1'..'b7' (BN already folded):
             w1..w6 shaped (out, in), w7 shaped (8, 1),
             b1..b7 shaped (out, 1).
    Returns (B, 1) float32.
    """
    B, D_in = x.shape
    D_pad = max(_round_up(D_in, 128), 128)

    # Batch tile: multiple of 128 (lane-dense output, feeds the 256-wide MXU well),
    # capped so tiny batches don't over-pad.  For large B the grid has >= 2 steps,
    # so the "parallel" batch axis shards across both TensorCores on v7x.
    tb = _round_up(min(batch_tile, _round_up(B, 128)), 128)
    B_pad = _round_up(B, tb)
    num_tiles = B_pad // tb

    # bf16 input; zero-pad batch and feature dims (zeros contribute nothing).
    xp = x.astype(jnp.bfloat16)
    if (B_pad != B) or (D_pad != D_in):
        xp = jnp.pad(xp, ((0, B_pad - B), (0, D_pad - D_in)))

    w1 = params["w1"]
    if w1.shape[1] != D_pad:
        w1 = jnp.pad(w1, ((0, 0), (0, D_pad - w1.shape[1])))

    def _const_spec(shape):
        # Weights/biases: full-array blocks, constant index map -> kept resident.
        return pl.BlockSpec(shape, lambda i: (0, 0))

    flat_args = [xp]
    in_specs = [pl.BlockSpec((tb, D_pad), lambda i: (i, 0))]

    # Layers 1..6: bf16 weights, f32 biases.
    flat_args += [w1.astype(jnp.bfloat16), params["b1"]]
    in_specs += [_const_spec((HIDDEN_DIMS[0], D_pad)), _const_spec(params["b1"].shape)]
    for li in range(2, 7):
        w = params[f"w{li}"].astype(jnp.bfloat16)
        b = params[f"b{li}"]
        flat_args += [w, b]
        in_specs += [_const_spec(w.shape), _const_spec(b.shape)]
    # Final layer stays f32 (VPU path, negligible cost).
    flat_args += [params["w7"], params["b7"]]
    in_specs += [_const_spec(params["w7"].shape), _const_spec(params["b7"].shape)]

    out = pl.pallas_call(
        _mlp_kernel,
        out_shape=jax.ShapeDtypeStruct((num_tiles, tb), jnp.float32),
        grid_spec=pltpu.PrefetchScalarGridSpec(
            num_scalar_prefetch=0,
            grid=(num_tiles,),
            in_specs=in_specs,
            out_specs=pl.BlockSpec((1, tb), lambda i: (i, 0)),
        ),
        compiler_params=pltpu.CompilerParams(
            dimension_semantics=("parallel",),
            vmem_limit_bytes=32 * 1024 * 1024,  # explicit; usage is < 2 MiB
        ),
    )(*flat_args)

    # Lane-dense (num_tiles, TB) -> (B, 1); drop batch padding.
    return out.reshape(B_pad, 1)[:B]


def init_params(key, input_size):
    """Deterministic init: Linear + BatchNorm1d(eval) stats, BN folded into the linears.

    Weight layout is PyTorch (out, in); the final layer weight is stored as a
    column (8, 1) for the in-kernel VPU reduction.  Biases are (out, 1) columns.
    """
    dims = [input_size] + HIDDEN_DIMS
    params = {}
    for li in range(1, 8):
        d_in, d_out = dims[li - 1], dims[li]
        key, kw, kb, kg, kbeta, km, kv = jax.random.split(key, 7)
        bound = 1.0 / jnp.sqrt(jnp.float32(d_in))
        w = jax.random.uniform(kw, (d_out, d_in), jnp.float32, -bound, bound)
        b = jax.random.uniform(kb, (d_out,), jnp.float32, -bound, bound)

        if li <= 6:
            gamma = 1.0 + 0.1 * jax.random.normal(kg, (d_out,), jnp.float32)
            beta = 0.1 * jax.random.normal(kbeta, (d_out,), jnp.float32)
            running_mean = 0.1 * jax.random.normal(km, (d_out,), jnp.float32)
            running_var = 1.0 + 0.1 * jax.random.uniform(kv, (d_out,), jnp.float32)
            s = gamma / jnp.sqrt(running_var + BN_EPS)
            w = w * s[:, None]
            b = (b - running_mean) * s + beta

        if li == 7:
            params["w7"] = w.reshape(d_in, 1)      # (8, 1) column
        else:
            params[f"w{li}"] = w                    # (out, in)
        params[f"b{li}"] = b.reshape(d_out, 1)      # (out, 1)
    return params


def reference_forward(x, params):
    """Pure-JAX f32 reference (same math, no Pallas) for verification."""
    h = x
    for li in range(1, 7):
        h = jnp.maximum(h @ params[f"w{li}"].T + params[f"b{li}"][:, 0], 0.0)
    z = h @ params["w7"] + params["b7"][:, 0]
    return jax.nn.sigmoid(z)


if __name__ == "__main__":
    key = jax.random.PRNGKey(0)
    input_size = 100   # deliberately not 128-aligned to exercise the padding path
    batch = 64

    kx, kp = jax.random.split(key)
    x = jax.random.normal(kx, (batch, input_size), jnp.float32)
    params = init_params(kp, input_size)

    out = anomaly_detector_forward(x, params, batch_tile=512)
    out = jax.block_until_ready(out)

    ref = reference_forward(x, params)
    assert out.shape == (batch, 1)
    # bf16 inputs/weights (f32 accumulation) vs f32 reference -> relaxed tolerance.
    assert jnp.allclose(out, ref, atol=2e-2, rtol=2e-2), "mismatch vs reference"

    print("KERNEL_OK")
</pallas_src>

<mosaic_0001>
module attributes {stable_mosaic.version = 11 : i64} {
  func.func @_mlp_kernel(%arg0: i32, %arg1: memref<128x128xbf16, #tpu.memory_space<vmem>>, %arg2: memref<256x128xbf16, #tpu.memory_space<vmem>>, %arg3: memref<256x1xf32, #tpu.memory_space<vmem>>, %arg4: memref<128x256xbf16, #tpu.memory_space<vmem>>, %arg5: memref<128x1xf32, #tpu.memory_space<vmem>>, %arg6: memref<64x128xbf16, #tpu.memory_space<vmem>>, %arg7: memref<64x1xf32, #tpu.memory_space<vmem>>, %arg8: memref<32x64xbf16, #tpu.memory_space<vmem>>, %arg9: memref<32x1xf32, #tpu.memory_space<vmem>>, %arg10: memref<16x32xbf16, #tpu.memory_space<vmem>>, %arg11: memref<16x1xf32, #tpu.memory_space<vmem>>, %arg12: memref<8x16xbf16, #tpu.memory_space<vmem>>, %arg13: memref<8x1xf32, #tpu.memory_space<vmem>>, %arg14: memref<8x1xf32, #tpu.memory_space<vmem>>, %arg15: memref<1x1xf32, #tpu.memory_space<vmem>>, %arg16: memref<1x128xf32, #tpu.memory_space<vmem>>) attributes {dimension_semantics = [#tpu.dimension_semantics<parallel>], iteration_bounds = array<i64: 1>, scalar_prefetch = 0 : i64, scratch_operands = 0 : i64, tpu.core_type = #tpu.core_type<tc>, window_params = [{transform_indices = @transform_0, window_bounds = array<i64: 128, 128>}, {pipeline_mode = #tpu.pipeline_mode<synchronous>, transform_indices = @transform_1, window_bounds = array<i64: 256, 128>}, {pipeline_mode = #tpu.pipeline_mode<synchronous>, transform_indices = @transform_2, window_bounds = array<i64: 256, 1>}, {pipeline_mode = #tpu.pipeline_mode<synchronous>, transform_indices = @transform_3, window_bounds = array<i64: 128, 256>}, {pipeline_mode = #tpu.pipeline_mode<synchronous>, transform_indices = @transform_4, window_bounds = array<i64: 128, 1>}, {pipeline_mode = #tpu.pipeline_mode<synchronous>, transform_indices = @transform_5, window_bounds = array<i64: 64, 128>}, {pipeline_mode = #tpu.pipeline_mode<synchronous>, transform_indices = @transform_6, window_bounds = array<i64: 64, 1>}, {pipeline_mode = #tpu.pipeline_mode<synchronous>, transform_indices = @transform_7, window_bounds = array<i64: 32, 64>}, {pipeline_mode = #tpu.pipeline_mode<synchronous>, transform_indices = @transform_8, window_bounds = array<i64: 32, 1>}, {pipeline_mode = #tpu.pipeline_mode<synchronous>, transform_indices = @transform_9, window_bounds = array<i64: 16, 32>}, {pipeline_mode = #tpu.pipeline_mode<synchronous>, transform_indices = @transform_10, window_bounds = array<i64: 16, 1>}, {pipeline_mode = #tpu.pipeline_mode<synchronous>, transform_indices = @transform_11, window_bounds = array<i64: 8, 16>}, {pipeline_mode = #tpu.pipeline_mode<synchronous>, transform_indices = @transform_12, window_bounds = array<i64: 8, 1>}, {pipeline_mode = #tpu.pipeline_mode<synchronous>, transform_indices = @transform_13, window_bounds = array<i64: 8, 1>}, {pipeline_mode = #tpu.pipeline_mode<synchronous>, transform_indices = @transform_14, window_bounds = array<i64: 1, 1>}, {transform_indices = @transform_15, window_bounds = array<i64: 1, 128>}]} {
    %c0 = arith.constant 0 : index
    %c0_0 = arith.constant 0 : index
    %0 = vector.load %arg2[%c0, %c0_0] : memref<256x128xbf16, #tpu.memory_space<vmem>>, vector<256x128xbf16>
    %c0_1 = arith.constant 0 : index
    %c0_2 = arith.constant 0 : index
    %1 = vector.load %arg1[%c0_1, %c0_2] : memref<128x128xbf16, #tpu.memory_space<vmem>>, vector<128x128xbf16>
    %cst = arith.constant dense<0.000000e+00> : vector<256x128xf32>
    %2 = tpu.matmul %0, %1, %cst {dimension_numbers = #tpu.dot_dimension_numbers<[1], [1], [0], [0], [0, 0, 1, 0], [], []>} : vector<256x128xbf16>, vector<128x128xbf16>, vector<256x128xf32> -> vector<256x128xf32>
    %c0_3 = arith.constant 0 : index
    %c0_4 = arith.constant 0 : index
    %3 = vector.load %arg3[%c0_3, %c0_4] : memref<256x1xf32, #tpu.memory_space<vmem>>, vector<256x1xf32>
    %4 = vector.broadcast %3 : vector<256x1xf32> to vector<256x128xf32>
    %5 = arith.addf %2, %4 : vector<256x128xf32>
    %cst_5 = arith.constant 0.000000e+00 : f32
    %6 = vector.broadcast %cst_5 : f32 to vector<256x128xf32>
    %7 = arith.maximumf %5, %6 : vector<256x128xf32>
    %8 = arith.truncf %7 : vector<256x128xf32> to vector<256x128xbf16>
    %c0_6 = arith.constant 0 : index
    %c0_7 = arith.constant 0 : index
    %9 = vector.load %arg4[%c0_6, %c0_7] : memref<128x256xbf16, #tpu.memory_space<vmem>>, vector<128x256xbf16>
    %cst_8 = arith.constant dense<0.000000e+00> : vector<128x128xf32>
    %10 = tpu.matmul %9, %8, %cst_8 {dimension_numbers = #tpu.dot_dimension_numbers<[1], [0], [0], [1], [0, 0, 1, 1], [], []>} : vector<128x256xbf16>, vector<256x128xbf16>, vector<128x128xf32> -> vector<128x128xf32>
    %c0_9 = arith.constant 0 : index
    %c0_10 = arith.constant 0 : index
    %11 = vector.load %arg5[%c0_9, %c0_10] : memref<128x1xf32, #tpu.memory_space<vmem>>, vector<128x1xf32>
    %12 = vector.broadcast %11 : vector<128x1xf32> to vector<128x128xf32>
    %13 = arith.addf %10, %12 : vector<128x128xf32>
    %cst_11 = arith.constant 0.000000e+00 : f32
    %14 = vector.broadcast %cst_11 : f32 to vector<128x128xf32>
    %15 = arith.maximumf %13, %14 : vector<128x128xf32>
    %16 = arith.truncf %15 : vector<128x128xf32> to vector<128x128xbf16>
    %c0_12 = arith.constant 0 : index
    %c0_13 = arith.constant 0 : index
    %17 = vector.load %arg6[%c0_12, %c0_13] : memref<64x128xbf16, #tpu.memory_space<vmem>>, vector<64x128xbf16>
    %cst_14 = arith.constant dense<0.000000e+00> : vector<64x128xf32>
    %18 = tpu.matmul %17, %16, %cst_14 {dimension_numbers = #tpu.dot_dimension_numbers<[1], [0], [0], [1], [0, 0, 1, 1], [], []>} : vector<64x128xbf16>, vector<128x128xbf16>, vector<64x128xf32> -> vector<64x128xf32>
    %c0_15 = arith.constant 0 : index
    %c0_16 = arith.constant 0 : index
    %19 = vector.load %arg7[%c0_15, %c0_16] : memref<64x1xf32, #tpu.memory_space<vmem>>, vector<64x1xf32>
    %20 = vector.broadcast %19 : vector<64x1xf32> to vector<64x128xf32>
    %21 = arith.addf %18, %20 : vector<64x128xf32>
    %cst_17 = arith.constant 0.000000e+00 : f32
    %22 = vector.broadcast %cst_17 : f32 to vector<64x128xf32>
    %23 = arith.maximumf %21, %22 : vector<64x128xf32>
    %24 = arith.truncf %23 : vector<64x128xf32> to vector<64x128xbf16>
    %c0_18 = arith.constant 0 : index
    %c0_19 = arith.constant 0 : index
    %25 = vector.load %arg8[%c0_18, %c0_19] : memref<32x64xbf16, #tpu.memory_space<vmem>>, vector<32x64xbf16>
    %cst_20 = arith.constant dense<0.000000e+00> : vector<32x128xf32>
    %26 = tpu.matmul %25, %24, %cst_20 {dimension_numbers = #tpu.dot_dimension_numbers<[1], [0], [0], [1], [0, 0, 1, 1], [], []>} : vector<32x64xbf16>, vector<64x128xbf16>, vector<32x128xf32> -> vector<32x128xf32>
    %c0_21 = arith.constant 0 : index
    %c0_22 = arith.constant 0 : index
    %27 = vector.load %arg9[%c0_21, %c0_22] : memref<32x1xf32, #tpu.memory_space<vmem>>, vector<32x1xf32>
    %28 = vector.broadcast %27 : vector<32x1xf32> to vector<32x128xf32>
    %29 = arith.addf %26, %28 : vector<32x128xf32>
    %cst_23 = arith.constant 0.000000e+00 : f32
    %30 = vector.broadcast %cst_23 : f32 to vector<32x128xf32>
    %31 = arith.maximumf %29, %30 : vector<32x128xf32>
    %32 = arith.truncf %31 : vector<32x128xf32> to vector<32x128xbf16>
    %c0_24 = arith.constant 0 : index
    %c0_25 = arith.constant 0 : index
    %33 = vector.load %arg10[%c0_24, %c0_25] : memref<16x32xbf16, #tpu.memory_space<vmem>>, vector<16x32xbf16>
    %cst_26 = arith.constant dense<0.000000e+00> : vector<16x128xf32>
    %34 = tpu.matmul %33, %32, %cst_26 {dimension_numbers = #tpu.dot_dimension_numbers<[1], [0], [0], [1], [0, 0, 1, 1], [], []>} : vector<16x32xbf16>, vector<32x128xbf16>, vector<16x128xf32> -> vector<16x128xf32>
    %c0_27 = arith.constant 0 : index
    %c0_28 = arith.constant 0 : index
    %35 = vector.load %arg11[%c0_27, %c0_28] : memref<16x1xf32, #tpu.memory_space<vmem>>, vector<16x1xf32>
    %36 = vector.broadcast %35 : vector<16x1xf32> to vector<16x128xf32>
    %37 = arith.addf %34, %36 : vector<16x128xf32>
    %cst_29 = arith.constant 0.000000e+00 : f32
    %38 = vector.broadcast %cst_29 : f32 to vector<16x128xf32>
    %39 = arith.maximumf %37, %38 : vector<16x128xf32>
    %40 = arith.truncf %39 : vector<16x128xf32> to vector<16x128xbf16>
    %c0_30 = arith.constant 0 : index
    %c0_31 = arith.constant 0 : index
    %41 = vector.load %arg12[%c0_30, %c0_31] : memref<8x16xbf16, #tpu.memory_space<vmem>>, vector<8x16xbf16>
    %cst_32 = arith.constant dense<0.000000e+00> : vector<8x128xf32>
    %42 = tpu.matmul %41, %40, %cst_32 {dimension_numbers = #tpu.dot_dimension_numbers<[1], [0], [0], [1], [0, 0, 1, 1], [], []>} : vector<8x16xbf16>, vector<16x128xbf16>, vector<8x128xf32> -> vector<8x128xf32>
    %c0_33 = arith.constant 0 : index
    %c0_34 = arith.constant 0 : index
    %43 = vector.load %arg13[%c0_33, %c0_34] : memref<8x1xf32, #tpu.memory_space<vmem>>, vector<8x1xf32>
    %44 = vector.broadcast %43 : vector<8x1xf32> to vector<8x128xf32>
    %45 = arith.addf %42, %44 : vector<8x128xf32>
    %cst_35 = arith.constant 0.000000e+00 : f32
    %46 = vector.broadcast %cst_35 : f32 to vector<8x128xf32>
    %47 = arith.maximumf %45, %46 : vector<8x128xf32>
    %48 = arith.truncf %47 : vector<8x128xf32> to vector<8x128xbf16>
    %49 = arith.extf %48 : vector<8x128xbf16> to vector<8x128xf32>
    %c0_36 = arith.constant 0 : index
    %c0_37 = arith.constant 0 : index
    %50 = vector.load %arg14[%c0_36, %c0_37] : memref<8x1xf32, #tpu.memory_space<vmem>>, vector<8x1xf32>
    %51 = vector.broadcast %50 : vector<8x1xf32> to vector<8x128xf32>
    %52 = arith.mulf %49, %51 : vector<8x128xf32>
    %cst_38 = arith.constant dense<0.000000e+00> : vector<128xf32>
    %53 = vector.multi_reduction <add>, %52, %cst_38 [0] : vector<8x128xf32> to vector<128xf32>
    %54 = vector.shape_cast %53 : vector<128xf32> to vector<1x128xf32>
    %c0_39 = arith.constant 0 : index
    %c0_40 = arith.constant 0 : index
    %55 = vector.load %arg15[%c0_39, %c0_40] : memref<1x1xf32, #tpu.memory_space<vmem>>, vector<1x1xf32>
    %56 = vector.broadcast %55 : vector<1x1xf32> to vector<1x128xf32>
    %57 = arith.addf %54, %56 : vector<1x128xf32>
    %cst_41 = arith.constant 0.000000e+00 : f32
    %58 = vector.broadcast %cst_41 : f32 to vector<1x128xf32>
    %59 = arith.subf %58, %57 : vector<1x128xf32>
    %60 = math.exp %59 : vector<1x128xf32>
    %cst_42 = arith.constant 1.000000e+00 : f32
    %61 = vector.broadcast %cst_42 : f32 to vector<1x128xf32>
    %62 = arith.addf %61, %60 : vector<1x128xf32>
    %cst_43 = arith.constant 1.000000e+00 : f32
    %63 = vector.broadcast %cst_43 : f32 to vector<1x128xf32>
    %64 = arith.divf %63, %62 : vector<1x128xf32>
    %c0_44 = arith.constant 0 : index
    %c0_45 = arith.constant 0 : index
    %65 = vector.load %arg16[%c0_44, %c0_45] : memref<1x128xf32, #tpu.memory_space<vmem>>, vector<1x128xf32>
    tpu.vector_store %arg16[%c0_44, %c0_45], %64 {strides = array<i32>} : memref<1x128xf32, #tpu.memory_space<vmem>>, vector<1x128xf32>,
    return
  }
  func.func @transform_0(%arg0: i32) -> (i32, i32) {
    %c0_i32 = arith.constant 0 : i32
    %c0_i32_0 = arith.constant 0 : i32
    return %arg0, %c0_i32 : i32, i32
  }
  func.func @transform_1(%arg0: i32) -> (i32, i32) {
    %c0_i32 = arith.constant 0 : i32
    %c0_i32_0 = arith.constant 0 : i32
    %c0_i32_1 = arith.constant 0 : i32
    return %c0_i32, %c0_i32_0 : i32, i32
  }
  func.func @transform_2(%arg0: i32) -> (i32, i32) {
    %c0_i32 = arith.constant 0 : i32
    %c0_i32_0 = arith.constant 0 : i32
    %c0_i32_1 = arith.constant 0 : i32
    return %c0_i32, %c0_i32_0 : i32, i32
  }
  func.func @transform_3(%arg0: i32) -> (i32, i32) {
    %c0_i32 = arith.constant 0 : i32
    %c0_i32_0 = arith.constant 0 : i32
    %c0_i32_1 = arith.constant 0 : i32
    return %c0_i32, %c0_i32_0 : i32, i32
  }
  func.func @transform_4(%arg0: i32) -> (i32, i32) {
    %c0_i32 = arith.constant 0 : i32
    %c0_i32_0 = arith.constant 0 : i32
    %c0_i32_1 = arith.constant 0 : i32
    return %c0_i32, %c0_i32_0 : i32, i32
  }
  func.func @transform_5(%arg0: i32) -> (i32, i32) {
    %c0_i32 = arith.constant 0 : i32
    %c0_i32_0 = arith.constant 0 : i32
    %c0_i32_1 = arith.constant 0 : i32
    return %c0_i32, %c0_i32_0 : i32, i32
  }
  func.func @transform_6(%arg0: i32) -> (i32, i32) {
    %c0_i32 = arith.constant 0 : i32
    %c0_i32_0 = arith.constant 0 : i32
    %c0_i32_1 = arith.constant 0 : i32
    return %c0_i32, %c0_i32_0 : i32, i32
  }
  func.func @transform_7(%arg0: i32) -> (i32, i32) {
    %c0_i32 = arith.constant 0 : i32
    %c0_i32_0 = arith.constant 0 : i32
    %c0_i32_1 = arith.constant 0 : i32
    return %c0_i32, %c0_i32_0 : i32, i32
  }
  func.func @transform_8(%arg0: i32) -> (i32, i32) {
    %c0_i32 = arith.constant 0 : i32
    %c0_i32_0 = arith.constant 0 : i32
    %c0_i32_1 = arith.constant 0 : i32
    return %c0_i32, %c0_i32_0 : i32, i32
  }
  func.func @transform_9(%arg0: i32) -> (i32, i32) {
    %c0_i32 = arith.constant 0 : i32
    %c0_i32_0 = arith.constant 0 : i32
    %c0_i32_1 = arith.constant 0 : i32
    return %c0_i32, %c0_i32_0 : i32, i32
  }
  func.func @transform_10(%arg0: i32) -> (i32, i32) {
    %c0_i32 = arith.constant 0 : i32
    %c0_i32_0 = arith.constant 0 : i32
    %c0_i32_1 = arith.constant 0 : i32
    return %c0_i32, %c0_i32_0 : i32, i32
  }
  func.func @transform_11(%arg0: i32) -> (i32, i32) {
    %c0_i32 = arith.constant 0 : i32
    %c0_i32_0 = arith.constant 0 : i32
    %c0_i32_1 = arith.constant 0 : i32
    return %c0_i32, %c0_i32_0 : i32, i32
  }
  func.func @transform_12(%arg0: i32) -> (i32, i32) {
    %c0_i32 = arith.constant 0 : i32
    %c0_i32_0 = arith.constant 0 : i32
    %c0_i32_1 = arith.constant 0 : i32
    return %c0_i32, %c0_i32_0 : i32, i32
  }
  func.func @transform_13(%arg0: i32) -> (i32, i32) {
    %c0_i32 = arith.constant 0 : i32
    %c0_i32_0 = arith.constant 0 : i32
    %c0_i32_1 = arith.constant 0 : i32
    return %c0_i32, %c0_i32_0 : i32, i32
  }
  func.func @transform_14(%arg0: i32) -> (i32, i32) {
    %c0_i32 = arith.constant 0 : i32
    %c0_i32_0 = arith.constant 0 : i32
    %c0_i32_1 = arith.constant 0 : i32
    return %c0_i32, %c0_i32_0 : i32, i32
  }
  func.func @transform_15(%arg0: i32) -> (i32, i32) {
    %c0_i32 = arith.constant 0 : i32
    %c0_i32_0 = arith.constant 0 : i32
    return %arg0, %c0_i32 : i32, i32
  }
}

</mosaic_0001>

<bundles_post_ra>
// kernel: tpu_custom_call.1
= control target key start
LH: loop header
LB: loop body
LE: loop exit
PB: predicated region body
PF: predicated region fallthrough
CT: control target
= control target key end

     0   :  { %s2298_s0 = inlined_call_operand.vmem [shape: bf16[128,128], index: 0, kind: input, shape index: {}]   ;;  %s2299_s1 = inlined_call_operand.vmem [shape: bf16[256,128], index: 1, kind: input, shape index: {}]   ;;  %s2300_s2 = inlined_call_operand.vmem [shape: f32[256,1], index: 2, kind: input, shape index: {}]   ;;  %s2301_s3 = inlined_call_operand.vmem [shape: bf16[128,256], index: 3, kind: input, shape index: {}]   ;;  %s2302_s4 = inlined_call_operand.vmem [shape: f32[128,1], index: 4, kind: input, shape index: {}]   ;;  %s2303_s5 = inlined_call_operand.vmem [shape: bf16[64,128], index: 5, kind: input, shape index: {}]   ;;  %s2304_s6 = inlined_call_operand.vmem [shape: f32[64,1], index: 6, kind: input, shape index: {}]   ;;  %s2305_s7 = inlined_call_operand.vmem [shape: bf16[32,64], index: 7, kind: input, shape index: {}]   ;;  %s2306_s8 = inlined_call_operand.vmem [shape: f32[32,1], index: 8, kind: input, shape index: {}]   ;;  %s2307_s9 = inlined_call_operand.vmem [shape: bf16[16,32], index: 9, kind: input, shape index: {}]   ;;  %s2308_s10 = inlined_call_operand.vmem [shape: f32[16,1], index: 10, kind: input, shape index: {}]   ;;  %s2309_s11 = inlined_call_operand.vmem [shape: bf16[8,16], index: 11, kind: input, shape index: {}]   ;;  %s2310_s12 = inlined_call_operand.vmem [shape: f32[8,1], index: 12, kind: input, shape index: {}]   ;;  %s2311_s13 = inlined_call_operand.vmem [shape: f32[8,1], index: 13, kind: input, shape index: {}]   ;;  %s2312_s14 = inlined_call_operand.<no memory space> [shape: f32[1,1], index: 14, kind: input, shape index: {}]   ;;  %s2313_s15 = inlined_call_operand.hbm [shape: f32[1,128], index: 15, kind: output, shape index: {}]  }
   0x1   :  { %v20_v0 = vstv %s2312_s14 }
   0x2   :  { %21 = vst [vmem:[#allocation2] sm:$0x1] %v20_v0 }
   0x3   :  { %v1649_v1 = vld [vmem:[%s2298_s0 + $0x38] sm:$0xff]   ;;  %v1650_v2 = vld [vmem:[%s2298_s0 + $0x30] sm:$0xff]   ;;  %v1730_v3 = vmov 0   ;;  %v1651_v8 = vld [vmem:[%s2298_s0 + $0x28] sm:$0xff]  }
   0x4   :  { %1647 = vset.pattern.permute.xlu0 %v1730_v3  ;;  %1648 = vset.pattern.permute.xlu1 %v1730_v3  ;;  %v132_v4 = vld [vmem:[%s2300_s2 + $0xf0] sm:$0xff]  ;;  %v133_v6 = vld [vmem:[%s2300_s2 + $0xf8] sm:$0xff]  ;;  %v130_v9 = vld [vmem:[%s2300_s2 + $0xe0] sm:$0xff] }
   0x5   :  { %1545 = vmatprep.subr.bf16.mxu0 %v1649_v1  ;;  %v116_v5 = vld [vmem:[%s2300_s2 + $0x70] sm:$0xff]  ;;  %286 = vperm.xlu0 %1647, %v132_v4   ;;  %v117_v7 = vld [vmem:[%s2300_s2 + $0x78] sm:$0xff]  ;;  %v131_v10 = vld [vmem:[%s2300_s2 + $0xe8] sm:$0xff] }
   0x6   :  { %1546 = vmatpush3.bf16.xpose.msra.mxu0 %v1649_v1  ;;  %206 = vperm.xlu1 %1648, %v116_v5   ;;  %v1657_v11 = vld [vmem:[%s2299_s1] sm:$0xff]   ;;  %v115_v13 = vld [vmem:[%s2300_s2 + $0x68] sm:$0xff]  ;;  %v128_v15 = vld [vmem:[%s2300_s2 + $0xd0] sm:$0xff] }
   0x7   :  { %1547 = vmatprep.subr.bf16.mxu0 %v1650_v2  ;;  %v114_v12 = vld [vmem:[%s2300_s2 + $0x60] sm:$0xff]  ;;  %1561 = vmatprep.mubr.bf16.mxu0 %v1657_v11  ;;  %v129_v16 = vld [vmem:[%s2300_s2 + $0xd8] sm:$0xff]  ;;  %v112_v17 = vld [vmem:[%s2300_s2 + $0x50] sm:$0xff] }
   0x8   :  { %v1652_v14 = vld [vmem:[%s2298_s0 + $0x20] sm:$0xff]   ;;  %v113_v18 = vld [vmem:[%s2300_s2 + $0x58] sm:$0xff]  ;;  %v127_v21 = vld [vmem:[%s2300_s2 + $0xc8] sm:$0xff] }
   0x9   :  { %291 = vperm.xlu0 %1647, %v133_v6   ;;  %v1653_v19 = vld [vmem:[%s2298_s0 + $0x18] sm:$0xff]   ;;  %v126_v20 = vld [vmem:[%s2300_s2 + $0xc0] sm:$0xff]  ;;  %v111_v23 = vld [vmem:[%s2300_s2 + $0x48] sm:$0xff] }
   0xa   :  { %211 = vperm.xlu1 %1648, %v117_v7   ;;  %v110_v22 = vld [vmem:[%s2300_s2 + $0x40] sm:$0xff]  ;;  %v1654_v24 = vld [vmem:[%s2298_s0 + $0x10] sm:$0xff]   ;;  %v125_v26 = vld [vmem:[%s2300_s2 + $0xb8] sm:$0xff] }
   0xb   :  { %v124_v25 = vld [vmem:[%s2300_s2 + $0xb0] sm:$0xff]  ;;  %v109_v28 = vld [vmem:[%s2300_s2 + $0x38] sm:$0xff]  ;;  %v1655_v29 = vld [vmem:[%s2298_s0 + $0x8] sm:$0xff]  }
   0xc   :  { %v108_v27 = vld [vmem:[%s2300_s2 + $0x30] sm:$0xff]  ;;  %v122_v30 = vld [vmem:[%s2300_s2 + $0xa0] sm:$0xff]  ;;  %v123_v31 = vld [vmem:[%s2300_s2 + $0xa8] sm:$0xff] }
   0xd   :  { %276 = vperm.xlu0 %1647, %v130_v9   ;;  %v106_v32 = vld [vmem:[%s2300_s2 + $0x20] sm:$0xff]  ;;  %v107_v33 = vld [vmem:[%s2300_s2 + $0x28] sm:$0xff]  ;;  %v120_v35 = vld [vmem:[%s2300_s2 + $0x90] sm:$0xff] }
   0xe   :  { %1548 = vmatpush3.bf16.xpose.msra.mxu0 %v1650_v2  ;;  %281 = vperm.xlu1 %1648, %v131_v10   ;;  %v1656_v34 = vld [vmem:[%s2298_s0] sm:$0xff]   ;;  %v121_v36 = vld [vmem:[%s2300_s2 + $0x98] sm:$0xff]  ;;  %v104_v37 = vld [vmem:[%s2300_s2 + $0x10] sm:$0xff] }
   0xf   :  { %1549 = vmatprep.subr.bf16.mxu0 %v1651_v8  ;;  %v105_v38 = vld [vmem:[%s2300_s2 + $0x18] sm:$0xff] }
  0x11   :  { %196 = vperm.xlu0 %1647, %v114_v12  }
  0x12   :  { %201 = vperm.xlu1 %1648, %v115_v13  }
  0x15   :  { %266 = vperm.xlu0 %1647, %v128_v15  }
  0x16   :  { %1550 = vmatpush3.bf16.xpose.msra.mxu0 %v1651_v8  ;;  %271 = vperm.xlu1 %1648, %v129_v16  }
  0x17   :  { %1551 = vmatprep.subr.bf16.mxu0 %v1652_v14 }
  0x19   :  { %186 = vperm.xlu0 %1647, %v112_v17  }
  0x1a   :  { %191 = vperm.xlu1 %1648, %v113_v18  }
  0x1d   :  { %256 = vperm.xlu0 %1647, %v126_v20  }
  0x1e   :  { %1552 = vmatpush3.bf16.xpose.msra.mxu0 %v1652_v14  ;;  %261 = vperm.xlu1 %1648, %v127_v21  }
  0x1f   :  { %1553 = vmatprep.subr.bf16.mxu0 %v1653_v19 }
  0x21   :  { %176 = vperm.xlu0 %1647, %v110_v22  }
  0x22   :  { %181 = vperm.xlu1 %1648, %v111_v23  }
  0x25   :  { %246 = vperm.xlu0 %1647, %v124_v25  }
  0x26   :  { %1554 = vmatpush3.bf16.xpose.msra.mxu0 %v1653_v19  ;;  %251 = vperm.xlu1 %1648, %v125_v26  }
  0x27   :  { %1555 = vmatprep.subr.bf16.mxu0 %v1654_v24 }
  0x29   :  { %166 = vperm.xlu0 %1647, %v108_v27  }
  0x2a   :  { %171 = vperm.xlu1 %1648, %v109_v28  }
  0x2d   :  { %236 = vperm.xlu0 %1647, %v122_v30  }
  0x2e   :  { %1556 = vmatpush3.bf16.xpose.msra.mxu0 %v1654_v24  ;;  %241 = vperm.xlu1 %1648, %v123_v31  }
  0x2f   :  { %1557 = vmatprep.subr.bf16.mxu0 %v1655_v29 }
  0x31   :  { %156 = vperm.xlu0 %1647, %v106_v32  }
  0x32   :  { %161 = vperm.xlu1 %1648, %v107_v33  }
  0x35   :  { %226 = vperm.xlu0 %1647, %v120_v35  }
  0x36   :  { %1558 = vmatpush3.bf16.xpose.msra.mxu0 %v1655_v29  ;;  %231 = vperm.xlu1 %1648, %v121_v36  }
  0x37   :  { %1559 = vmatprep.subr.bf16.mxu0 %v1656_v34 }
  0x38   :  { %22 = vsyncpa [#allocation4], 0  ;;  %v118_v39 = vld [vmem:[%s2300_s2 + $0x80] sm:$0xff]  ;;  %v119_v40 = vld [vmem:[%s2300_s2 + $0x88] sm:$0xff]  ;;  %vm1155_vm0 = vcmask 523264   ;;  %vm1732_vm1 = vmmov 0  }
  0x39   :  { %146 = vperm.xlu0 %1647, %v104_v37   ;;  %v1658_v41 = vld [vmem:[%s2299_s1 + $0x8] sm:$0xff]   ;;  %v1659_v42 = vld [vmem:[%s2299_s1 + $0x10] sm:$0xff]   ;;  %v102_v43 = vld [vmem:[%s2300_s2] sm:$0xff]  ;;  %vm1236_vm2 = vcmask 261120   ;;  %vm1291_vm3 = vcmask 130048  }
  0x3a   :  { %151 = vperm.xlu1 %1648, %v105_v38   ;;  %v103_v44 = vld [vmem:[%s2300_s2 + $0x8] sm:$0xff]  ;;  %v677_v45 = vld [vmem:[%s2302_s4 + $0x70] sm:$0xff]  ;;  %v678_v46 = vld [vmem:[%s2302_s4 + $0x78] sm:$0xff] }
  0x3b   :  { %v1660_v47 = vld [vmem:[%s2299_s1 + $0x18] sm:$0xff]   ;;  %v1661_v48 = vld [vmem:[%s2299_s1 + $0x20] sm:$0xff]   ;;  %v676_v50 = vld [vmem:[%s2302_s4 + $0x68] sm:$0xff] }
  0x3c   :  { %v675_v49 = vld [vmem:[%s2302_s4 + $0x60] sm:$0xff]  ;;  %v673_v51 = vld [vmem:[%s2302_s4 + $0x50] sm:$0xff]  ;;  %v674_v52 = vld [vmem:[%s2302_s4 + $0x58] sm:$0xff] }
  0x3d   :  { %216 = vperm.xlu0 %1647, %v118_v39   ;;  %v1662_v53 = vld [vmem:[%s2299_s1 + $0x28] sm:$0xff]   ;;  %v1663_v54 = vld [vmem:[%s2299_s1 + $0x30] sm:$0xff]   ;;  %v671_v55 = vld [vmem:[%s2302_s4 + $0x40] sm:$0xff] }
  0x3e   :  { %1560 = vmatpush3.bf16.xpose.msra.mxu0 %v1656_v34  ;;  %221 = vperm.xlu1 %1648, %v119_v40   ;;  %v672_v56 = vld [vmem:[%s2302_s4 + $0x48] sm:$0xff]  ;;  %v669_v57 = vld [vmem:[%s2302_s4 + $0x30] sm:$0xff]  ;;  %v670_v58 = vld [vmem:[%s2302_s4 + $0x38] sm:$0xff] }
  0x3f   :  { %v1664_v59 = vld [vmem:[%s2299_s1 + $0x38] sm:$0xff]   ;;  %v1665_v60 = vld [vmem:[%s2299_s1 + $0x40] sm:$0xff]   ;;  %v668_v62 = vld [vmem:[%s2302_s4 + $0x28] sm:$0xff] }
  0x40   :  { %v667_v61 = vld [vmem:[%s2302_s4 + $0x20] sm:$0xff]  ;;  %v665_v63 = vld [vmem:[%s2302_s4 + $0x10] sm:$0xff]  ;;  %v666_v0 = vld [vmem:[%s2302_s4 + $0x18] sm:$0xff] }
  0x41   :  { %136 = vperm.xlu0 %1647, %v102_v43   ;;  %v1666_v1 = vld [vmem:[%s2299_s1 + $0x48] sm:$0xff]   ;;  %v1667_v2 = vld [vmem:[%s2299_s1 + $0x50] sm:$0xff]   ;;  %v663_v3 = vld [vmem:[%s2302_s4] sm:$0xff] }
  0x42   :  { %141 = vperm.xlu1 %1648, %v103_v44   ;;  %v664_v4 = vld [vmem:[%s2302_s4 + $0x8] sm:$0xff]  ;;  %v974_v5 = vld [vmem:[%s2304_s6 + $0x30] sm:$0xff]  ;;  %v975_v6 = vld [vmem:[%s2304_s6 + $0x38] sm:$0xff] }
  0x43   :  { %v1668_v7 = vld [vmem:[%s2299_s1 + $0x58] sm:$0xff]   ;;  %v1669_v8 = vld [vmem:[%s2299_s1 + $0x60] sm:$0xff]   ;;  %v973_v10 = vld [vmem:[%s2304_s6 + $0x28] sm:$0xff] }
  0x44   :  { %v972_v9 = vld [vmem:[%s2304_s6 + $0x20] sm:$0xff]  ;;  %v970_v11 = vld [vmem:[%s2304_s6 + $0x10] sm:$0xff]  ;;  %v971_v12 = vld [vmem:[%s2304_s6 + $0x18] sm:$0xff] }
  0x45   :  { %1562 = vmatmul.mubr.bf16.vlgmr.msra.gmra.mxu0 %v1658_v41  ;;  %751 = vperm.xlu0 %1647, %v677_v45   ;;  %v1670_v13 = vld [vmem:[%s2299_s1 + $0x68] sm:$0xff]   ;;  %v1671_v14 = vld [vmem:[%s2299_s1 + $0x70] sm:$0xff]   ;;  %v968_v15 = vld [vmem:[%s2304_s6] sm:$0xff] }
  0x46   :  { %1565 = vmatprep.mubr.bf16.mxu0 %v1659_v42  ;;  %756 = vperm.xlu1 %1648, %v678_v46   ;;  %v969_v16 = vld [vmem:[%s2304_s6 + $0x8] sm:$0xff]  ;;  %v1123_v17 = vld [vmem:[%s2306_s8 + $0x10] sm:$0xff]  ;;  %v1124_v18 = vld [vmem:[%s2306_s8 + $0x18] sm:$0xff] }
  0x47   :  { %v1672_v19 = vld [vmem:[%s2299_s1 + $0x78] sm:$0xff]   ;;  %v1121_v20 = vld [vmem:[%s2306_s8] sm:$0xff]  ;;  %v1122_v21 = vld [vmem:[%s2306_s8 + $0x8] sm:$0xff] }
  0x48   :  { %v1219_v22 = vld [vmem:[%s2308_s10] sm:$0xff]  ;;  %v1220_v23 = vld [vmem:[%s2308_s10 + $0x8] sm:$0xff] }
  0x49   :  { %741 = vperm.xlu0 %1647, %v675_v49   ;;  %v1285_v24 = vld [vmem:[%s2310_s12] sm:$0xff] }
  0x4a   :  { %746 = vperm.xlu1 %1648, %v676_v50   ;;  %v1338_v25 = vld [vmem:[%s2311_s13] sm:$0xff] }
  0x4b   :  { %v1351_v26 = vld [vmem:[#allocation2] sm:$0x1]  ;;  %v1675_v46 = vld [vmem:[%s2301_s3 + $0x4] ss:$8 sps:$4 sm:$0xff]  }
  0x4c   :  { %871 = vmatprep.mubr.bf16.mxu1 %v1675_v46 }
  0x4d   :  { %1566 = vmatmul.mubr.bf16.gmra.mxu0 %v1660_v47  ;;  %731 = vperm.xlu0 %1647, %v673_v51  }
  0x4e   :  { %1569 = vmatprep.mubr.bf16.mxu0 %v1661_v48  ;;  %736 = vperm.xlu1 %1648, %v674_v52  }
  0x51   :  { %721 = vperm.xlu0 %1647, %v671_v55  }
  0x52   :  { %726 = vperm.xlu1 %1648, %v672_v56  }
  0x55   :  { %1570 = vmatmul.mubr.bf16.gmra.mxu0 %v1662_v53  ;;  %711 = vperm.xlu0 %1647, %v669_v57  }
  0x56   :  { %1573 = vmatprep.mubr.bf16.mxu0 %v1663_v54  ;;  %716 = vperm.xlu1 %1648, %v670_v58  }
  0x59   :  { %701 = vperm.xlu0 %1647, %v667_v61  }
  0x5a   :  { %706 = vperm.xlu1 %1648, %v668_v62  }
  0x5d   :  { %1574 = vmatmul.mubr.bf16.gmra.mxu0 %v1664_v59  ;;  %691 = vperm.xlu0 %1647, %v665_v63  }
  0x5e   :  { %1577 = vmatprep.mubr.bf16.mxu0 %v1665_v60  ;;  %696 = vperm.xlu1 %1648, %v666_v0  }
  0x61   :  { %681 = vperm.xlu0 %1647, %v663_v3  }
  0x62   :  { %686 = vperm.xlu1 %1648, %v664_v4  }
  0x65   :  { %1578 = vmatmul.mubr.bf16.gmra.mxu0 %v1666_v1  ;;  %1008 = vperm.xlu0 %1647, %v974_v5  }
  0x66   :  { %1581 = vmatprep.mubr.bf16.mxu0 %v1667_v2  ;;  %1013 = vperm.xlu1 %1648, %v975_v6  }
  0x69   :  { %998 = vperm.xlu0 %1647, %v972_v9  }
  0x6a   :  { %1003 = vperm.xlu1 %1648, %v973_v10  }
  0x6d   :  { %1582 = vmatmul.mubr.bf16.gmra.mxu0 %v1668_v7  ;;  %988 = vperm.xlu0 %1647, %v970_v11  }
  0x6e   :  { %1585 = vmatprep.mubr.bf16.mxu0 %v1669_v8  ;;  %993 = vperm.xlu1 %1648, %v971_v12  }
  0x71   :  { %978 = vperm.xlu0 %1647, %v968_v15  }
  0x72   :  { %983 = vperm.xlu1 %1648, %v969_v16  }
  0x75   :  { %1586 = vmatmul.mubr.bf16.gmra.mxu0 %v1670_v13  ;;  %1137 = vperm.xlu0 %1647, %v1123_v17  }
  0x76   :  { %1589 = vmatprep.mubr.bf16.mxu0 %v1671_v14  ;;  %1142 = vperm.xlu1 %1648, %v1124_v18  }
  0x79   :  { %1127 = vperm.xlu0 %1647, %v1121_v20  }
  0x7a   :  { %1132 = vperm.xlu1 %1648, %v1122_v21  }
  0x7d   :  { %1590 = vmatmul.mubr.bf16.gmra.mxu0 %v1672_v19  ;;  %1223 = vperm.xlu0 %1647, %v1219_v22  }
  0x7e   :  { %1228 = vperm.xlu1 %1648, %v1220_v23  }
  0x80   :  { %v2081_v27 = vpop.permute.xlu0 %286 }
  0x81   :  { %1288 = vperm.xlu0 %1647, %v1285_v24   ;;  %v2083_v28 = vpop.permute.xlu1 %206 }
  0x82   :  { %1341 = vperm.xlu1 %1648, %v1338_v25  }
  0x84   :  { %v2085_v29 = vpop.permute.xlu0 %291 }
  0x85   :  { %1354 = vperm.xlu0 %1647, %v1351_v26   ;;  %v2087_v30 = vpop.permute.xlu1 %211 }
  0x88   :  { %v2089_v31 = vpop.permute.xlu0 %276 }
  0x89   :  { %v2091_v32 = vpop.permute.xlu1 %281 }
  0x8c   :  { %v2093_v33 = vpop.permute.xlu0 %196 }
  0x8d   :  { %v2095_v34 = vpop.permute.xlu1 %201 }
  0x90   :  { %v2097_v35 = vpop.permute.xlu0 %266 }
  0x91   :  { %v2099_v36 = vpop.permute.xlu1 %271 }
  0x94   :  { %v2101_v37 = vpop.permute.xlu0 %186 }
  0x95   :  { %v2103_v38 = vpop.permute.xlu1 %191 }
  0x98   :  { %v2105_v39 = vpop.permute.xlu0 %256 }
  0x99   :  { %v2107_v40 = vpop.permute.xlu1 %261 }
  0x9c   :  { %v2109_v41 = vpop.permute.xlu0 %176 }
  0x9d   :  { %v2111_v42 = vpop.permute.xlu1 %181 }
  0xa0   :  { %v2113_v43 = vpop.permute.xlu0 %246 }
  0xa1   :  { %v2115_v44 = vpop.permute.xlu1 %251 }
  0xa4   :  { %v167_v45 = vpop.permute.xlu0 %166 }
  0xa5   :  { %v172_v47 = vpop.permute.xlu1 %171 }
  0xa8   :  { %v2120_v48 = vpop.permute.xlu0 %236 }
  0xa9   :  { %v2122_v49 = vpop.permute.xlu1 %241 }
  0xac   :  { %v157_v50 = vpop.permute.xlu0 %156 }
  0xad   :  { %v162_v51 = vpop.permute.xlu1 %161 }
  0xb0   :  { %v2124_v52 = vpop.permute.xlu0 %226 }
  0xb1   :  { %v2126_v53 = vpop.permute.xlu1 %231 }
  0xb4   :  { %v147_v54 = vpop.permute.xlu0 %146 }
  0xb5   :  { %v152_v55 = vpop.permute.xlu1 %151 }
  0xb8   :  { %v2128_v56 = vpop.permute.xlu0 %216 }
  0xb9   :  { %v2130_v57 = vpop.permute.xlu1 %221 }
  0xbc   :  { %v137_v61 = vpop.permute.xlu0 %136 }
  0xbd   :  { %v142_v1 = vpop.permute.xlu1 %141 }
 0x105   :  { %v1563_v58 = vpop.f32.mrf.mxu0 }
 0x106   :  { %v481_v60 = vadd.f32 %v1563_v58, %v147_v54 }
 0x107   :  { %v472_v59 = vpop.f32.mrf.mxu0 }
 0x108   :  { %v473_v63 = vadd.f32 %v472_v59, %v137_v61  ;;  %v601_v3 = vmax.f32 %v481_v60, 0.0 }
 0x109   :  { %v1564_v62 = vpop.f32.mrf.mxu0 }
 0x10a   :  { %v484_v0 = vadd.f32 %v1564_v62, %v152_v55  ;;  %v599_v7 = vmax.f32 %v473_v63, 0.0 }
 0x10b   :  { %v475_v2 = vpop.f32.mrf.mxu0 }
 0x10c   :  { %v602_v4 = vmax.f32 %v484_v0, 0.0  ;;  %v476_v5 = vadd.f32 %v475_v2, %v142_v1 }
 0x10d   :  { %v1567_v6 = vpop.f32.mrf.mxu0 }
 0x10e   :  { %v2132_v8 = vpack.c.bf16 %v602_v4, %v601_v3  ;;  %v600_v9 = vmax.f32 %v476_v5, 0.0  ;;  %v497_v12 = vadd.f32 %v1567_v6, %v167_v45 }
 0x10f   :  { %v488_v10 = vpop.f32.mrf.mxu0 }
 0x110   :  { %v2134_v11 = vpack.c.bf16 %v600_v9, %v599_v7  ;;  %v489_v14 = vadd.f32 %v488_v10, %v157_v50  ;;  %v605_v17 = vmax.f32 %v497_v12, 0.0 }
 0x111   :  { %v1568_v13 = vpop.f32.mrf.mxu0 }
 0x112   :  { %v500_v15 = vadd.f32 %v1568_v13, %v172_v47  ;;  %v603_v21 = vmax.f32 %v489_v14, 0.0 }
 0x113   :  { %v491_v16 = vpop.f32.mrf.mxu0 }
 0x114   :  { %v606_v18 = vmax.f32 %v500_v15, 0.0  ;;  %v492_v19 = vadd.f32 %v491_v16, %v162_v51 }
 0x115   :  { %v1571_v20 = vpop.f32.mrf.mxu0 }
 0x116   :  { %v2136_v22 = vpack.c.bf16 %v606_v18, %v605_v17  ;;  %v604_v23 = vmax.f32 %v492_v19, 0.0 }
 0x117   :  { %v504_v24 = vpop.f32.mrf.mxu0 }
 0x118   :  { %v2138_v25 = vpack.c.bf16 %v604_v23, %v603_v21 }
 0x119   :  { %v1572_v26 = vpop.f32.mrf.mxu0 }
 0x11b   :  { %v507_v46 = vpop.f32.mrf.mxu0 }
 0x11d   :  { %v1575_v54 = vpop.f32.mrf.mxu0 }
 0x11e   :  { %v529_v9 = vadd.f32 %v1575_v54, %v2083_v28 }
 0x11f   :  { %v520_v55 = vpop.f32.mrf.mxu0 }
 0x120   :  { %v613_v21 = vmax.f32 %v529_v9, 0.0 }
 0x121   :  { %v1576_v45 = vpop.f32.mrf.mxu0 }
 0x122   :  { %v532_v5 = vadd.f32 %v1576_v45, %v2087_v30 }
 0x123   :  { %v523_v58 = vpop.f32.mrf.mxu0 }
 0x124   :  { %v614_v14 = vmax.f32 %v532_v5, 0.0  ;;  %v524_v15 = vadd.f32 %v523_v58, %v2095_v34 }
 0x125   :  { %v2140_v50 = vpop.f32.mrf.mxu0 }
 0x126   :  { %v612_v45 = vmax.f32 %v524_v15, 0.0  ;;  %v1688_v15 = vld [vmem:[%s2301_s3 + $0x54] ss:$8 sps:$4 sm:$0xff]  }
 0x127   :  { %v2142_v47 = vpop.f32.mrf.mxu0 }
 0x129   :  { %v2144_v59 = vpop.f32.mrf.mxu0 }
 0x12b   :  { %v2146_v51 = vpop.f32.mrf.mxu0 }
 0x12d   :  { %v1583_v60 = vpop.f32.mrf.mxu0 }
 0x12f   :  { %v552_v61 = vpop.f32.mrf.mxu0 }
 0x131   :  { %v1584_v62 = vpop.f32.mrf.mxu0 }
 0x133   :  { %v555_v63 = vpop.f32.mrf.mxu0 }
 0x135   :  { %v1587_v0 = vpop.f32.mrf.mxu0 }
 0x136   :  { %v577_v28 = vadd.f32 %v1587_v0, %v2097_v35 }
 0x137   :  { %v568_v1 = vpop.f32.mrf.mxu0 }
 0x138   :  { %v625_v5 = vmax.f32 %v577_v28, 0.0 }
 0x139   :  { %v1588_v2 = vpop.f32.mrf.mxu0 }
 0x13a   :  { %v580_v17 = vadd.f32 %v1588_v2, %v2099_v36  ;;  %v513_v2 = vadd.f32 %v1571_v20, %v2101_v37  ;;  %v561_v37 = vadd.f32 %v1583_v60, %v2113_v43  ;;  %v545_v60 = vadd.f32 %v2140_v50, %v2124_v52  ;;  %v1684_v50 = vld [vmem:[%s2301_s3 + $0x30] ss:$8 sps:$4 sm:$0xff]  }
 0x13b   :  { %v571_v3 = vpop.f32.mrf.mxu0 }
 0x13c   :  { %v626_v34 = vmax.f32 %v580_v17, 0.0  ;;  %v572_v58 = vadd.f32 %v571_v3, %v2107_v40  ;;  %v505_v40 = vadd.f32 %v504_v24, %v2109_v41  ;;  %v548_v41 = vadd.f32 %v2144_v59, %v2126_v53  ;;  %v1691_v17 = vld [vmem:[%s2301_s3 + $0x64] ss:$8 sps:$4 sm:$0xff]  }
 0x13d   :  { %v1591_v4 = vpop.f32.mrf.mxu0 }
 0x13e   :  { %v593_v7 = vadd.f32 %v1591_v4, %v2081_v27  ;;  %v521_v27 = vadd.f32 %v520_v55, %v2093_v33  ;;  %v638_v4 = vpack.c.bf16 %v614_v14, %v613_v21  ;;  %v569_v33 = vadd.f32 %v568_v1, %v2105_v39  ;;  %v2225_v21 = vpop.permute.xlu0 %751 }
 0x13f   :  { %v584_v6 = vpop.f32.mrf.mxu0  ;;  %v508_v55 = vadd.f32 %v507_v46, %v2111_v42  ;;  %v556_v1 = vadd.f32 %v555_v63, %v2122_v49  ;;  %v607_v42 = vmax.f32 %v505_v40, 0.0  ;;  %v621_v46 = vmax.f32 %v561_v37, 0.0 }
 0x140   :  { %v585_v12 = vadd.f32 %v584_v6, %v2089_v31  ;;  %v629_v18 = vmax.f32 %v593_v7, 0.0  ;;  %v624_v6 = vmax.f32 %v572_v58, 0.0  ;;  %v609_v7 = vmax.f32 %v513_v2, 0.0 }
 0x141   :  { %v1592_v10 = vpop.f32.mrf.mxu0  ;;  %v623_v20 = vmax.f32 %v569_v33, 0.0  ;;  %v608_v9 = vmax.f32 %v508_v55, 0.0  ;;  %v620_v43 = vmax.f32 %v556_v1, 0.0  ;;  %v618_v49 = vmax.f32 %v548_v41, 0.0 }
 0x142   :  { %v596_v13 = vadd.f32 %v1592_v10, %v2085_v29  ;;  %v627_v23 = vmax.f32 %v585_v12, 0.0  ;;  %v516_v29 = vadd.f32 %v1572_v26, %v2103_v38  ;;  %v564_v38 = vadd.f32 %v1584_v62, %v2115_v44  ;;  %v2229_v28 = vpop.permute.xlu0 %741 }
 0x143   :  { %v587_v16 = vpop.f32.mrf.mxu0  ;;  %v644_v26 = vpack.c.bf16 %v626_v34, %v625_v5  ;;  %v643_v10 = vpack.c.bf16 %v624_v6, %v623_v20  ;;  %v553_v44 = vadd.f32 %v552_v61, %v2120_v48  ;;  %v635_v62 = vpack.c.bf16 %v608_v9, %v607_v42 }
 0x144   :  { %v630_v19 = vmax.f32 %v596_v13, 0.0  ;;  %v588_v30 = vadd.f32 %v587_v16, %v2091_v32  ;;  %v611_v32 = vmax.f32 %v521_v27, 0.0  ;;  %v610_v35 = vmax.f32 %v516_v29, 0.0  ;;  %v1690_v16 = vld [vmem:[%s2301_s3 + $0x50] ss:$8 sps:$4 sm:$0xff]   ;;  %v2227_v27 = vpop.permute.xlu1 %756 }
 0x145   :  { %v622_v39 = vmax.f32 %v564_v38, 0.0  ;;  %v619_v12 = vmax.f32 %v553_v44, 0.0  ;;  %v540_v63 = vadd.f32 %v2146_v51, %v2130_v57  ;;  %v617_v48 = vmax.f32 %v545_v60, 0.0  ;;  %v1673_v57 = vld [vmem:[%s2301_s3] ss:$8 sps:$4 sm:$0xff]  }
 0x146   :  { %v628_v54 = vmax.f32 %v588_v30, 0.0  ;;  %v646_v31 = vpack.c.bf16 %v630_v19, %v629_v18  ;;  %v637_v0 = vpack.c.bf16 %v612_v45, %v611_v32  ;;  %v636_v3 = vpack.c.bf16 %v610_v35, %v609_v7  ;;  %v1687_v51 = vld [vmem:[%s2301_s3 + $0x40] ss:$8 sps:$4 sm:$0xff]   ;;  %v1694_v19 = vld [vmem:[%s2301_s3 + $0x74] ss:$8 sps:$4 sm:$0xff]  }
 0x147   :  { %v642_v24 = vpack.c.bf16 %v622_v39, %v621_v46  ;;  %v641_v13 = vpack.c.bf16 %v620_v43, %v619_v12  ;;  %v537_v61 = vadd.f32 %v2142_v47, %v2128_v56  ;;  %v640_v53 = vpack.c.bf16 %v618_v49, %v617_v48  ;;  %v1676_v56 = vld [vmem:[%s2301_s3 + $0x14] ss:$8 sps:$4 sm:$0xff]   ;;  %v1685_v47 = vld [vmem:[%s2301_s3 + $0x44] ss:$8 sps:$4 sm:$0xff]   ;;  %v1693_v18 = vld [vmem:[%s2301_s3 + $0x60] ss:$8 sps:$4 sm:$0xff]  }
 0x148   :  { %v645_v36 = vpack.c.bf16 %v628_v54, %v627_v23  ;;  %1458 = vmatprep.subr.bf16.mxu1 %v646_v31  ;;  %v616_v59 = vmax.f32 %v540_v63, 0.0  ;;  %v1696_v30 = vld [vmem:[%s2301_s3 + $0x70] ss:$8 sps:$4 sm:$0xff]   ;;  %v2231_v23 = vpop.permute.xlu1 %746  ;;  %v1697_v54 = vld [vmem:[%s2303_s5] sm:$0xff]   ;;  %v2236_v31 = vpop.permute.xlu0 %731 }
 0x149   :  { %1459 = vmatpush3.bf16.msra.mxu1 %v638_v4  ;;  %v615_v14 = vmax.f32 %v537_v61, 0.0 }
 0x14a   :  { %1460 = vmatprep.subr.bf16.mxu1 %v645_v36 }
 0x14b   :  { %v639_v52 = vpack.c.bf16 %v616_v59, %v615_v14 }
 0x14c   :  { %v2238_v29 = vpop.permute.xlu1 %736  ;;  %v2240_v45 = vpop.permute.xlu0 %721 }
 0x14d   :  { %1461 = vmatpush3.bf16.msra.mxu1 %v637_v0 }
 0x14e   :  { %1462 = vmatprep.subr.bf16.mxu1 %v644_v26 }
 0x150   :  { %v2242_v4 = vpop.permute.xlu1 %726  ;;  %v2244_v34 = vpop.permute.xlu0 %711 }
 0x151   :  { %1463 = vmatpush3.bf16.msra.mxu1 %v636_v3 }
 0x152   :  { %1464 = vmatprep.subr.bf16.mxu1 %v643_v10 }
 0x154   :  { %v2246_v58 = vpop.permute.xlu1 %716  ;;  %v2248_v36 = vpop.permute.xlu0 %701 }
 0x155   :  { %1465 = vmatpush3.bf16.msra.mxu1 %v635_v62 }
 0x156   :  { %1466 = vmatprep.subr.bf16.mxu1 %v642_v24 }
 0x158   :  { %v2250_v2 = vpop.permute.xlu1 %706  ;;  %v692_v32 = vpop.permute.xlu0 %691 }
 0x159   :  { %1467 = vmatpush3.bf16.msra.mxu1 %v2136_v22  ;;  %v1678_v22 = vld [vmem:[%s2301_s3 + $0x10] ss:$8 sps:$4 sm:$0xff]  }
 0x15a   :  { %1468 = vmatprep.subr.bf16.mxu1 %v641_v13 }
 0x15c   :  { %v697_v33 = vpop.permute.xlu1 %696  ;;  %v682_v38 = vpop.permute.xlu0 %681 }
 0x15d   :  { %1469 = vmatpush3.bf16.msra.mxu1 %v2138_v25  ;;  %v1682_v25 = vld [vmem:[%s2301_s3 + $0x34] ss:$8 sps:$4 sm:$0xff]  }
 0x15e   :  { %1470 = vmatprep.subr.bf16.mxu1 %v640_v53 }
 0x160   :  { %v687_v40 = vpop.permute.xlu1 %686 }
 0x161   :  { %1471 = vmatpush3.bf16.msra.mxu1 %v2132_v8  ;;  %v1679_v8 = vld [vmem:[%s2301_s3 + $0x24] ss:$8 sps:$4 sm:$0xff]  }
 0x162   :  { %1472 = vmatprep.subr.bf16.mxu1 %v639_v52 }
 0x165   :  { %1473 = vmatpush3.bf16.msra.mxu1 %v2134_v11  ;;  %v1681_v11 = vld [vmem:[%s2301_s3 + $0x20] ss:$8 sps:$4 sm:$0xff]  }
 0x168   :  { %872 = vmatmul.mubr.bf16.vlgmr.msra.gmra.mxu1 %v1673_v57 }
 0x169   :  { %879 = vmatprep.mubr.bf16.mxu1 %v1676_v56 }
 0x170   :  { %880 = vmatmul.mubr.bf16.gmra.mxu1 %v1678_v22 }
 0x171   :  { %887 = vmatprep.mubr.bf16.mxu1 %v1679_v8 }
 0x178   :  { %888 = vmatmul.mubr.bf16.gmra.mxu1 %v1681_v11 }
 0x179   :  { %895 = vmatprep.mubr.bf16.mxu1 %v1682_v25 }
 0x180   :  { %896 = vmatmul.mubr.bf16.gmra.mxu1 %v1684_v50 }
 0x181   :  { %903 = vmatprep.mubr.bf16.mxu1 %v1685_v47 }
 0x188   :  { %904 = vmatmul.mubr.bf16.gmra.mxu1 %v1687_v51 }
 0x189   :  { %911 = vmatprep.mubr.bf16.mxu1 %v1688_v15 }
 0x190   :  { %912 = vmatmul.mubr.bf16.gmra.mxu1 %v1690_v16 }
 0x191   :  { %919 = vmatprep.mubr.bf16.mxu1 %v1691_v17 }
 0x198   :  { %920 = vmatmul.mubr.bf16.gmra.mxu1 %v1693_v18 }
 0x199   :  { %927 = vmatprep.mubr.bf16.mxu1 %v1694_v19 }
 0x1a0   :  { %928 = vmatmul.mubr.bf16.gmra.mxu1 %v1696_v30 }
 0x1a1   :  { %1609 = vmatprep.mubr.bf16.mxu1 %v1697_v54 }
 0x228   :  { %v1474_v5 = vpop.f32.mrf.mxu1 }
 0x22a   :  { %v1475_v35 = vpop.f32.mrf.mxu1 }
 0x22b   :  { %v1476_v55 = vadd.f32 %v1475_v35, %v1474_v5 }
 0x22c   :  { %v1477_v0 = vpop.f32.mrf.mxu1 }
 0x22d   :  { %v874_v6 = vadd.f32 %v1476_v55, %v682_v38 }
 0x22e   :  { %v1478_v26 = vpop.f32.mrf.mxu1 }
 0x22f   :  { %v1479_v7 = vadd.f32 %v1478_v26, %v1477_v0  ;;  %v936_v9 = vmax.f32 %v874_v6, 0.0 }
 0x230   :  { %v1480_v37 = vpop.f32.mrf.mxu1 }
 0x231   :  { %v877_v20 = vadd.f32 %v1479_v7, %v687_v40 }
 0x232   :  { %v1481_v3 = vpop.f32.mrf.mxu1 }
 0x233   :  { %v937_v39 = vmax.f32 %v877_v20, 0.0  ;;  %v1482_v1 = vadd.f32 %v1481_v3, %v1480_v37 }
 0x234   :  { %v1483_v10 = vpop.f32.mrf.mxu1 }
 0x235   :  { %v2252_v42 = vpack.c.bf16 %v937_v39, %v936_v9  ;;  %v882_v44 = vadd.f32 %v1482_v1, %v692_v32 }
 0x236   :  { %v1484_v46 = vpop.f32.mrf.mxu1 }
 0x237   :  { %v1485_v62 = vadd.f32 %v1484_v46, %v1483_v10  ;;  %v938_v60 = vmax.f32 %v882_v44, 0.0 }
 0x238   :  { %v1486_v41 = vpop.f32.mrf.mxu1 }
 0x239   :  { %v885_v24 = vadd.f32 %v1485_v62, %v697_v33 }
 0x23a   :  { %v1487_v43 = vpop.f32.mrf.mxu1 }
 0x23b   :  { %v939_v12 = vmax.f32 %v885_v24, 0.0 }
 0x23c   :  { %v1489_v49 = vpop.f32.mrf.mxu1 }
 0x23d   :  { %v2254_v63 = vpack.c.bf16 %v939_v12, %v938_v60 }
 0x23e   :  { %v1490_v13 = vpop.f32.mrf.mxu1 }
 0x240   :  { %v1492_v48 = vpop.f32.mrf.mxu1 }
 0x242   :  { %v1493_v61 = vpop.f32.mrf.mxu1 }
 0x244   :  { %v1495_v53 = vpop.f32.mrf.mxu1 }
 0x246   :  { %v1496_v59 = vpop.f32.mrf.mxu1 }
 0x248   :  { %v1498_v14 = vpop.f32.mrf.mxu1 }
 0x24a   :  { %v1499_v52 = vpop.f32.mrf.mxu1 }
 0x24b   :  { %v1500_v3 = vadd.f32 %v1499_v52, %v1498_v14 }
 0x24c   :  { %v1501_v57 = vpop.f32.mrf.mxu1 }
 0x24e   :  { %v1502_v56 = vpop.f32.mrf.mxu1 }
 0x24f   :  { %v1503_v6 = vadd.f32 %v1502_v56, %v1501_v57 }
 0x250   :  { %v1504_v22 = vpop.f32.mrf.mxu1 }
 0x252   :  { %v1505_v8 = vpop.f32.mrf.mxu1 }
 0x253   :  { %v1506_v0 = vadd.f32 %v1505_v8, %v1504_v22 }
 0x254   :  { %v1507_v11 = vpop.f32.mrf.mxu1 }
 0x255   :  { %v914_v9 = vadd.f32 %v1506_v0, %v2236_v31  ;;  %v1488_v31 = vadd.f32 %v1487_v43, %v1486_v41  ;;  %v1701_v41 = vld [vmem:[%s2305_s7] sm:$0xff]   ;;  %v1014_v43 = vpop.permute.xlu1 %1013 }
 0x256   :  { %v1508_v25 = vpop.f32.mrf.mxu1 }
 0x257   :  { %v1509_v5 = vadd.f32 %v1508_v25, %v1507_v11  ;;  %v946_v44 = vmax.f32 %v914_v9, 0.0 }
 0x258   :  { %v1510_v50 = vpop.f32.mrf.mxu1 }
 0x259   :  { %v917_v7 = vadd.f32 %v1509_v5, %v2238_v29  ;;  %v1491_v29 = vadd.f32 %v1490_v13, %v1489_v49  ;;  %v1004_v56 = vpop.permute.xlu1 %1003 }
 0x25a   :  { %v1511_v47 = vpop.f32.mrf.mxu1 }
 0x25b   :  { %v1512_v54 = vadd.f32 %v1511_v47, %v1510_v50  ;;  %v947_v10 = vmax.f32 %v917_v7, 0.0 }
 0x25c   :  { %v1513_v51 = vpop.f32.mrf.mxu1 }
 0x25d   :  { %v922_v38 = vadd.f32 %v1512_v54, %v2229_v28  ;;  %v1494_v28 = vadd.f32 %v1493_v61, %v1492_v48  ;;  %v957_v60 = vpack.c.bf16 %v947_v10, %v946_v44  ;;  %v994_v47 = vpop.permute.xlu1 %993 }
 0x25e   :  { %v1514_v15 = vpop.f32.mrf.mxu1 }
 0x25f   :  { %v1515_v18 = vadd.f32 %v1514_v15, %v1513_v51  ;;  %v948_v39 = vmax.f32 %v922_v38, 0.0  ;;  %v898_v12 = vadd.f32 %v1494_v28, %v2244_v34  ;;  %v1698_v34 = vld [vmem:[%s2303_s5 + $0x8] sm:$0xff]  }
 0x260   :  { %v1516_v16 = vpop.f32.mrf.mxu1 }
 0x261   :  { %v925_v33 = vadd.f32 %v1515_v18, %v2231_v23  ;;  %v1497_v23 = vadd.f32 %v1496_v59, %v1495_v53  ;;  %v942_v48 = vmax.f32 %v898_v12, 0.0  ;;  %v984_v0 = vpop.permute.xlu1 %983 }
 0x262   :  { %v1517_v17 = vpop.f32.mrf.mxu1 }
 0x263   :  { %v1518_v19 = vadd.f32 %v1517_v17, %v1516_v16  ;;  %v949_v40 = vmax.f32 %v925_v33, 0.0  ;;  %v901_v62 = vadd.f32 %v1497_v23, %v2246_v58  ;;  %v1731_v23 = vmov 0.0  }
 0x264   :  { %v1519_v30 = vpop.f32.mrf.mxu1  ;;  %1637 = vmatprep.subr.bf16.mxu0 %v1731_v23  ;;  %1639 = vmatprep.mubr.msk.bf16.mxu0 %vm1732_vm1, %v1731_v23 }
 0x265   :  { %v930_v35 = vadd.f32 %v1518_v19, %v2225_v21  ;;  %v909_v21 = vadd.f32 %v1503_v6, %v2242_v4  ;;  %v958_v46 = vpack.c.bf16 %v949_v40, %v948_v39  ;;  %v893_v4 = vadd.f32 %v1491_v29, %v2250_v2  ;;  %v1700_v2 = vld [vmem:[%s2303_s5 + $0x18] sm:$0xff]   ;;  %v1143_v10 = vpop.permute.xlu1 %1142 }
 0x266   :  { %v1520_v32 = vpop.f32.mrf.mxu1  ;;  %v943_v59 = vmax.f32 %v901_v62, 0.0 }
 0x267   :  { %v1521_v55 = vadd.f32 %v1520_v32, %v1519_v30  ;;  %v950_v37 = vmax.f32 %v930_v35, 0.0  ;;  %v945_v24 = vmax.f32 %v909_v21, 0.0  ;;  %v941_v49 = vmax.f32 %v893_v4, 0.0 }
 0x268   :  { %v955_v13 = vpack.c.bf16 %v943_v59, %v942_v48 }
 0x269   :  { %v933_v26 = vadd.f32 %v1521_v55, %v2227_v27  ;;  %v906_v27 = vadd.f32 %v1500_v3, %v2240_v45  ;;  %v890_v45 = vadd.f32 %v1488_v31, %v2248_v36  ;;  %v1699_v36 = vld [vmem:[%s2303_s5 + $0x10] sm:$0xff]  }
 0x26b   :  { %v951_v20 = vmax.f32 %v933_v26, 0.0  ;;  %v944_v53 = vmax.f32 %v906_v27, 0.0  ;;  %v940_v58 = vmax.f32 %v890_v45, 0.0 }
 0x26d   :  { %v959_v1 = vpack.c.bf16 %v951_v20, %v950_v37  ;;  %v956_v14 = vpack.c.bf16 %v945_v24, %v944_v53  ;;  %v954_v61 = vpack.c.bf16 %v941_v49, %v940_v58  ;;  %v1133_v24 = vpop.permute.xlu1 %1132  ;;  %v1703_v49 = vld [vmem:[%s2307_s9] sm:$0xff]   ;;  %s1733_s9 = smov [#allocation3]  }
 0x26f   :  { %1593 = vmatprep.subr.bf16.mxu1 %v959_v1 }
 0x270   :  { %1594 = vmatpush3.bf16.msra.mxu1 %v959_v1  ;;  %v1702_v1 = vld [vmem:[%s2305_s7 + $0x8] sm:$0xff]  }
 0x271   :  { %1595 = vmatprep.subr.bf16.mxu1 %v958_v46 }
 0x274   :  { %1596 = vmatpush3.bf16.msra.mxu1 %v958_v46 }
 0x275   :  { %1597 = vmatprep.subr.bf16.mxu1 %v957_v60 }
 0x278   :  { %1598 = vmatpush3.bf16.msra.mxu1 %v957_v60 }
 0x279   :  { %1599 = vmatprep.subr.bf16.mxu1 %v956_v14 }
 0x27c   :  { %1600 = vmatpush3.bf16.msra.mxu1 %v956_v14 }
 0x27d   :  { %1601 = vmatprep.subr.bf16.mxu1 %v955_v13 }
 0x280   :  { %1602 = vmatpush3.bf16.msra.mxu1 %v955_v13 }
 0x281   :  { %1603 = vmatprep.subr.bf16.mxu1 %v954_v61 }
 0x284   :  { %1604 = vmatpush3.bf16.msra.mxu1 %v954_v61 }
 0x285   :  { %1605 = vmatprep.subr.bf16.mxu1 %v2254_v63 }
 0x288   :  { %1606 = vmatpush3.bf16.msra.mxu1 %v2254_v63  ;;  %v1009_v63 = vpop.permute.xlu0 %1008 }
 0x289   :  { %1607 = vmatprep.subr.bf16.mxu1 %v2252_v42 }
 0x28c   :  { %1608 = vmatpush3.bf16.msra.mxu1 %v2252_v42  ;;  %v999_v8 = vpop.permute.xlu0 %998 }
 0x28f   :  { %1610 = vmatmul.mubr.bf16.vlgmr.msra.gmra.mxu1 %v1698_v34 }
 0x290   :  { %1613 = vmatprep.mubr.bf16.mxu1 %v1699_v36  ;;  %v989_v17 = vpop.permute.xlu0 %988  ;;  %v1229_v36 = vpop.permute.xlu1 %1228 }
 0x294   :  { %v979_v7 = vpop.permute.xlu0 %978 }
 0x297   :  { %1614 = vmatmul.mubr.bf16.gmra.mxu1 %v1700_v2 }
 0x298   :  { %1625 = vmatprep.mubr.msk.bf16.mxu1 %vm1155_vm0, %v1701_v41  ;;  %v1138_v21 = vpop.permute.xlu0 %1137 }
 0x29c   :  { %v1128_v29 = vpop.permute.xlu0 %1127 }
 0x2a0   :  { %v1224_v58 = vpop.permute.xlu0 %1223 }
 0x34f   :  { %v1611_v42 = vpop.f32.mrf.mxu1 }
 0x350   :  { %v1083_v5 = vadd.f32 %v1611_v42, %v989_v17  ;;  %v1357_v17 = vlaneseq }
 0x351   :  { %v1074_v52 = vpop.f32.mrf.mxu1 }
 0x352   :  { %v1107_v40 = vmax.f32 %v1083_v5, 0.0  ;;  %v1075_v37 = vadd.f32 %v1074_v52, %v979_v7 }
 0x353   :  { %v1612_v57 = vpop.f32.mrf.mxu1 }
 0x354   :  { %v1086_v19 = vadd.f32 %v1612_v57, %v994_v47  ;;  %v1105_v9 = vmax.f32 %v1075_v37, 0.0  ;;  %v1284_v57 = vld [vmem:[%s2309_s11] sm:$0xf]  ;;  %s1375_s11 = sshll.u32 %s1733_s9, 4  ;;  %s1376_s11 = int_to_ptr.vmem [resolvable:$true] %s1375_s11 }
 0x355   :  { %v1077_v22 = vpop.f32.mrf.mxu1  ;;  %s1708_s17 = scalar_lea.vmem %s1376_s11, 16  ;;  %s1712_s1 = scalar_lea.vmem %s1376_s11, 32 }
 0x356   :  { %v1108_v38 = vmax.f32 %v1086_v19, 0.0  ;;  %v1078_v26 = vadd.f32 %v1077_v22, %v984_v0  ;;  %p1709_p0 = scmp.ne.s32.totalorder %s1376_s11, %s1708_s17  ;;  %p1713_p1 = scmp.lt.s32.totalorder %s1376_s11, %s1376_s11 }
 0x357   :  { %v1615_v11 = vpop.f32.mrf.mxu1  ;;  %p1714_p2 = scmp.lt.s32.totalorder %s1712_s1, %s1708_s17 }
 0x358   :  { %v1099_v50 = vadd.f32 %v1615_v11, %v1009_v63  ;;  %v1114_v20 = vpack.c.bf16 %v1108_v38, %v1107_v40  ;;  %v1106_v3 = vmax.f32 %v1078_v26, 0.0 }
 0x359   :  { %v1090_v25 = vpop.f32.mrf.mxu1  ;;  %p1715_p3 = por %p1714_p2, %p1713_p1 }
 0x35a   :  { %v1091_v15 = vadd.f32 %v1090_v25, %v999_v8  ;;  %v1111_v30 = vmax.f32 %v1099_v50, 0.0  ;;  %v1113_v39 = vpack.c.bf16 %v1106_v3, %v1105_v9 }
 0x35b   :  { %v1616_v51 = vpop.f32.mrf.mxu1  ;;  %p1716_p4 = pnand %p1715_p3, %p1709_p0 }
 0x35c   :  { %v1102_v16 = vadd.f32 %v1616_v51, %v1014_v43  ;;  %v1109_v33 = vmax.f32 %v1091_v15, 0.0 }
 0x35d   :  { %v1093_v18 = vpop.f32.mrf.mxu1 }
 0x35e   :  { %v1112_v54 = vmax.f32 %v1102_v16, 0.0  ;;  %v1094_v32 = vadd.f32 %v1093_v18, %v1004_v56  ;;  %v1289_v56 = vpop.permute.xlu0 %1288  ;;  %v1342_v16 = vpop.permute.xlu1 %1341 }
 0x360   :  { %v1116_v35 = vpack.c.bf16 %v1112_v54, %v1111_v30  ;;  %v1110_v55 = vmax.f32 %v1094_v32, 0.0  ;;  %v1358_v30 = vshrl.u32 %v1357_v17, 7 }
 0x362   :  { %v1115_v6 = vpack.c.bf16 %v1110_v55, %v1109_v33  ;;  %1617 = vmatprep.subr.bf16.mxu1 %v1116_v35  ;;  %v1359_v5 = vsub.s32 0, %v1358_v30 }
 0x363   :  { %1618 = vmatpush3.bf16.msra.mxu1 %v1116_v35  ;;  %v1355_v35 = vpop.permute.xlu0 %1354 }
 0x364   :  { %1619 = vmatprep.subr.bf16.mxu1 %v1115_v6  ;;  %v1360_v0 = vrot.slane %v1355_v35, %v1359_v5 }
 0x367   :  { %1620 = vmatpush3.bf16.msra.mxu1 %v1115_v6 }
 0x368   :  { %1621 = vmatprep.subr.bf16.mxu1 %v1114_v20 }
 0x36b   :  { %1622 = vmatpush3.bf16.msra.mxu1 %v1114_v20 }
 0x36c   :  { %1623 = vmatprep.subr.bf16.mxu1 %v1113_v39 }
 0x36f   :  { %1624 = vmatpush3.bf16.msra.mxu1 %v1113_v39 }
 0x370   :  { %1629 = vmatprep.subr.bf16.mxu1 %v1731_v23 }
 0x372   :  { %1626 = vmatmul.mubr.msk.bf16.vlgmr.msra.gmra.mxu1 %vm1155_vm0, %v1702_v1 }
 0x373   :  { %1633 = vmatprep.mubr.msk.bf16.mxu1 %vm1732_vm1, %v1731_v23 }
 0x432   :  { %v1627_v46 = vpop.f32.mrf.mxu1 }
 0x433   :  { %v1205_v27 = vadd.f32 %v1627_v46, %v1138_v21 }
 0x434   :  { %v1196_v28 = vpop.f32.mrf.mxu1 }
 0x435   :  { %v1213_v31 = vmax.f32 %v1205_v27, 0.0  ;;  %v1197_v12 = vadd.f32 %v1196_v28, %v1128_v29 }
 0x436   :  { %v1628_v44 = vpop.f32.mrf.mxu1 }
 0x437   :  { %v1208_v62 = vadd.f32 %v1628_v44, %v1143_v10  ;;  %v1211_v45 = vmax.f32 %v1197_v12, 0.0 }
 0x438   :  { %v1199_v60 = vpop.f32.mrf.mxu1 }
 0x439   :  { %v1214_v53 = vmax.f32 %v1208_v62, 0.0  ;;  %v1200_v4 = vadd.f32 %v1199_v60, %v1133_v24 }
 0x43b   :  { %v1216_v59 = vpack.c.bf16 %v1214_v53, %v1213_v31  ;;  %v1212_v14 = vmax.f32 %v1200_v4, 0.0 }
 0x43d   :  { %1630 = vmatpush3.bf16.msra.mxu1 %v1216_v59  ;;  %v1215_v48 = vpack.c.bf16 %v1212_v14, %v1211_v45 }
 0x43e   :  { %1631 = vmatprep.subr.bf16.mxu1 %v1731_v23 }
 0x441   :  { %1632 = vmatpush3.bf16.msra.mxu1 %v1215_v48 }
 0x444   :  { %1634 = vmatmul.mubr.msk.bf16.vlgmr.msra.gmra.mxu1 %vm1236_vm2, %v1703_v49 }
 0x504   :  { %v1274_v13 = vpop.f32.mrf.mxu1 }
 0x505   :  { %v1275_v34 = vadd.f32 %v1274_v13, %v1224_v58 }
 0x506   :  { %v1635_v61 = vpop.f32.mrf.mxu1 }
 0x507   :  { %v1281_v42 = vmax.f32 %v1275_v34, 0.0 }
 0x508   :  { %v1277_v2 = vpop.f32.mrf.mxu1 }
 0x509   :  { %v1278_v41 = vadd.f32 %v1277_v2, %v1229_v36 }
 0x50a   :  { %v1636_v43 = vpop.f32.mrf.mxu1 }
 0x50b   :  { %v1282_v63 = vmax.f32 %v1278_v41, 0.0 }
 0x50d   :  { %v1283_v52 = vpack.c.bf16 %v1282_v63, %v1281_v42 }
 0x50f   :  { %1638 = vmatpush3.bf16.msra.mxu0 %v1283_v52 }
 0x512   :  { %1640 = vmatmul.mubr.msk.bf16.vlgmr.msra.gmra.mxu0 %vm1291_vm3, %v1284_v57 }
 0x5d2   :  { %v1329_v22 = vpop.f32.mrf.mxu0 }
 0x5d3   :  { %v1330_v8 = vadd.f32 %v1329_v22, %v1289_v56 }
 0x5d4   :  { %v1641_v11 = vpop.f32.mrf.mxu0 }
 0x5d5   :  { %v1335_v25 = vmax.f32 %v1330_v8, 0.0 }
 0x5d6   :  { %v1332_v50 = vpop.f32.mrf.mxu0 }
 0x5d7   :  { %v1336_v47 = vpack.c.bf16 %v1335_v25, %v1335_v25 }
 0x5d8   :  { %v1642_v51 = vpop.f32.mrf.mxu0 }
 0x5d9   :  { %v1337_v15 = vunpack.c.l.bf16 %v1336_v47 }
 0x5db   :  { %v1344_v18 = vmul.f32 %v1342_v16, %v1337_v15 }
 0x5dd   :  { %v1345_v19 = vrot.slane %v1344_v18, 4 }
 0x5df   :  { %v1346_v54 = vadd.f32 %v1345_v19, %v1344_v18 }
 0x5e1   :  { %v1347_v32 = vrot.slane %v1346_v54, 2 }
 0x5e3   :  { %v1348_v33 = vadd.f32 %v1347_v32, %v1346_v54 }
 0x5e5   :  { %v1349_v55 = vrot.slane %v1348_v33, 1 }
 0x5e7   :  { %v1350_v38 = vadd.f32 %v1349_v55, %v1348_v33 }
 0x5e9   :  { %v1361_v26 = vadd.f32 %v1360_v0, %v1350_v38 }
 0x5eb   :  { %v1362_v6 = vsub.f32 0.0, %v1361_v26 }
 0x5ed   :  { %v1363_v7 = vmul.f32 1.442695, %v1362_v6 }
 0x5ef   :  { %1704 = vpow2.f32 %v1363_v7 }
 0x5fc   :  { %v1705_v40 = vpop.eup %1704 }
 0x5fd   :  { %v1365_v37 = vadd.f32 1.0, %v1705_v40 }
 0x5ff   :  { %1706 = vrcp.f32 %v1365_v37 }
 0x60c   :  { %v1707_v20 = vpop.eup %1706 }
 0x60d   :  { %1368 = vst [vmem:[#allocation3] sm:$0x1] %v1707_v20 }
 0x60e   :  { %1719 = shalt.err (!%p1716_p4)
}
 0x60f   :  { %1378 = dma.vmem_to_hbm [thread:$0]  %s1376_s11, 16, %s2313_s15, [#allocation4]  }
 0x610   :  { %1728 = dma.done.wait [#allocation4], 16  }
 0x611   :  { %1729 = vsyncadd [#allocation4], 4294967280 }
 0x612   :  { %1382 = vsyncpa [#allocation4], 1 }

</bundles_post_ra>
